<compile_context>
chip_gen: v6e
topology: v6e:2x2x1
jax: 0.10.0
libtpu: 0.0.40
codegen_flags: <defaults>
</compile_context>

<pallas_src>
import math
from functools import partial

import jax
import jax.numpy as jnp
from jax.experimental import pallas as pl
from jax.experimental.pallas import tpu as pltpu


# ------------------------------ fused attention kernel ------------------------------ #
def _fused_attention_kernel(x_ref, wqkv_ref, bqkv_ref, wproj_ref, bproj_ref,
                            out_ref, attn_ref, ctx_scratch,
                            *, num_heads, head_dim, scale, mxu_dtype):
    H, hd = num_heads, head_dim
    C = H * hd

    # ---- fused QKV projection: one fat lane-dense (N, C) @ (C, 3C) matmul ----
    x = x_ref[0].astype(mxu_dtype)                                    # (N, C)
    qkv = jnp.dot(x, wqkv_ref[...].astype(mxu_dtype),
                  preferred_element_type=jnp.float32)                 # (N, 3C), f32 accum
    qkv = qkv + bqkv_ref[...].astype(jnp.float32)

    # ---- hoist scaling + casts out of the head loop (3 casts total, not 3*H) ----
    q_all = (qkv[:, :C] * scale).astype(mxu_dtype)                    # scale folded into q
    k_all = qkv[:, C:2 * C].astype(mxu_dtype)
    v_all = qkv[:, 2 * C:].astype(mxu_dtype)

    # ---- per-head attention (static loop -> static slices only) ----
    for h in range(H):
        lo, hi = h * hd, (h + 1) * hd
        q = q_all[:, lo:hi]                                           # (N, hd)
        k = k_all[:, lo:hi]
        v = v_all[:, lo:hi]

        # scores: contract head_dim directly (no materialized transpose of k)
        s = jax.lax.dot_general(
            q, k,
            dimension_numbers=(((1,), (1,)), ((), ())),
            preferred_element_type=jnp.float32)                       # (N, N) f32

        # numerically-stable softmax in f32 (matches torch: max-subtraction + softmax)
        s = s - jnp.max(s, axis=-1, keepdims=True)
        p = jnp.exp(s)
        inv_l = pl.reciprocal(jnp.sum(p, axis=-1, keepdims=True))     # N exact reciprocals
        p = p * inv_l                                                 # normalized probs

        attn_ref[0, h] = p.astype(attn_ref.dtype)                     # lane-dense (N, N)

        ctx_h = jnp.dot(p.astype(mxu_dtype), v,
                        preferred_element_type=jnp.float32)           # (N, hd) f32
        ctx_scratch[:, lo:hi] = ctx_h.astype(ctx_scratch.dtype)       # assemble (N, C)

    # ---- fused output projection: (N, C) @ (C, C) + bias, lane-dense store ----
    out = jnp.dot(ctx_scratch[...], wproj_ref[...].astype(mxu_dtype),
                  preferred_element_type=jnp.float32)
    out = out + bproj_ref[...].astype(jnp.float32)
    out_ref[0] = out.astype(out_ref.dtype)


def _vmem_limit_bytes(B, N, C, H):
    """Rough per-step VMEM working-set estimate; None if the default scoped limit is fine."""
    f32 = 4
    blocks = 2 * (N * C + N * C + H * N * N) * f32            # x / out / attn (double-buffered)
    weights = (3 * C * C + 3 * C + C * C + C) * f32           # resident weights + biases
    interm = (3 * N * C + 4 * N * N + N * C) * f32            # qkv, score temps, ctx scratch
    est = blocks + weights + interm
    if est <= 12 * (1 << 20):
        return None
    # cap at 60 MiB so the same code path stays valid on v7x's 64 MiB physical VMEM
    return int(min(est * 5 // 4, 60 * (1 << 20)))


def attention_forward(x, w_qkv, b_qkv, w_proj, b_proj, *, num_heads, scale,
                      mxu_dtype=jnp.float32):
    """x: (B, N, C). Weights in (in_features, out_features) layout. Returns (out, attn)."""
    B, N, C = x.shape
    H = num_heads
    hd = C // H
    kernel = partial(_fused_attention_kernel, num_heads=H, head_dim=hd,
                     scale=scale, mxu_dtype=mxu_dtype)

    cp_kwargs = dict(dimension_semantics=("parallel",))
    limit = _vmem_limit_bytes(B, N, C, H)
    if limit is not None:
        cp_kwargs["vmem_limit_bytes"] = limit

    out, attn = pl.pallas_call(
        kernel,
        out_shape=(
            jax.ShapeDtypeStruct((B, N, C), x.dtype),
            jax.ShapeDtypeStruct((B, H, N, N), jnp.float32),
        ),
        grid_spec=pltpu.PrefetchScalarGridSpec(
            num_scalar_prefetch=0,
            grid=(B,),
            in_specs=[
                pl.BlockSpec((1, N, C), lambda b: (b, 0, 0)),        # x[b]
                pl.BlockSpec((C, 3 * C), lambda b: (0, 0)),          # W_qkv  (VMEM-resident)
                pl.BlockSpec((1, 3 * C), lambda b: (0, 0)),          # b_qkv  (VMEM-resident)
                pl.BlockSpec((C, C), lambda b: (0, 0)),              # W_proj (VMEM-resident)
                pl.BlockSpec((1, C), lambda b: (0, 0)),              # b_proj (VMEM-resident)
            ],
            out_specs=[
                pl.BlockSpec((1, N, C), lambda b: (b, 0, 0)),        # out[b]  lane-dense C
                pl.BlockSpec((1, H, N, N), lambda b: (b, 0, 0, 0)),  # attn[b] lane-dense N
            ],
            scratch_shapes=[pltpu.VMEM((N, C), mxu_dtype)],          # ctx assembly buffer
        ),
        compiler_params=pltpu.CompilerParams(**cp_kwargs),
    )(x, w_qkv, b_qkv, w_proj, b_proj)
    return out, attn


# ------------------------------------- module --------------------------------------- #
class AttentionPallas:
    """Pallas-TPU port of the PyTorch Attention module (eval mode, dropout = identity)."""

    def __init__(self, dim, num_heads=8, qkv_bias=False, qk_scale=None,
                 mxu_dtype=jnp.float32, key=None):
        assert dim % num_heads == 0
        self.dim = dim
        self.num_heads = num_heads
        self.head_dim = dim // num_heads
        self.scale = qk_scale or self.head_dim ** (-0.5)
        self.mxu_dtype = mxu_dtype

        key = jax.random.PRNGKey(0) if key is None else key
        k1, k2, k3, k4 = jax.random.split(key, 4)
        bound = 1.0 / math.sqrt(dim)
        # (in_features, out_features) layout so the kernel computes x @ W.
        self.w_qkv = jax.random.uniform(k1, (dim, 3 * dim), jnp.float32, -bound, bound)
        if qkv_bias:
            self.b_qkv = jax.random.uniform(k4, (1, 3 * dim), jnp.float32, -bound, bound)
        else:
            self.b_qkv = jnp.zeros((1, 3 * dim), jnp.float32)
        self.w_proj = jax.random.uniform(k2, (dim, dim), jnp.float32, -bound, bound)
        self.b_proj = jax.random.uniform(k3, (1, dim), jnp.float32, -bound, bound)

    def __call__(self, x, mxu_dtype=None):
        # attn_drop / proj_drop have p = 0.0 (eval mode) -> identity.
        return attention_forward(
            x, self.w_qkv, self.b_qkv, self.w_proj, self.b_proj,
            num_heads=self.num_heads, scale=self.scale,
            mxu_dtype=self.mxu_dtype if mxu_dtype is None else mxu_dtype)


# ----------------------------------- reference --------------------------------------- #
def _reference(x, mod):
    B, N, C = x.shape
    H, hd = mod.num_heads, mod.head_dim
    qkv = x @ mod.w_qkv + mod.b_qkv[0]
    qkv = qkv.reshape(B, N, 3, H, hd).transpose(2, 0, 3, 1, 4)
    q, k, v = qkv[0], qkv[1], qkv[2]
    attn = jnp.einsum('bhnd,bhmd->bhnm', q, k) * mod.scale
    attn = attn - jnp.max(attn, axis=-1, keepdims=True)
    attn = jax.nn.softmax(attn, axis=-1)
    out = jnp.einsum('bhnm,bhmd->bhnd', attn, v)
    out = out.transpose(0, 2, 1, 3).reshape(B, N, C)
    out = out @ mod.w_proj + mod.b_proj[0]
    return out, attn


if __name__ == "__main__":
    B, N, C, H = 2, 8, 32, 8
    key = jax.random.PRNGKey(0)
    kx, kp = jax.random.split(key)
    x = jax.random.normal(kx, (B, N, C), jnp.float32)

    mod = AttentionPallas(dim=C, num_heads=H, key=kp)

    # f32 MXU path: exact match against the plain-JAX reference.
    out, attn = mod(x)
    out = jax.block_until_ready(out)
    attn = jax.block_until_ready(attn)

    ref_out, ref_attn = _reference(x, mod)
    assert out.shape == (B, N, C) and attn.shape == (B, H, N, N)
    assert jnp.allclose(out, ref_out, atol=1e-4, rtol=1e-4)
    assert jnp.allclose(attn, ref_attn, atol=1e-5, rtol=1e-5)

    # bf16 MXU path (production speed path: bf16 operands, f32 accumulation + f32 softmax).
    out_bf, attn_bf = mod(x, mxu_dtype=jnp.bfloat16)
    out_bf = jax.block_until_ready(out_bf)
    attn_bf = jax.block_until_ready(attn_bf)
    assert bool(jnp.isfinite(out_bf).all()) and bool(jnp.isfinite(attn_bf).all())
    assert float(jnp.max(jnp.abs(out_bf - ref_out))) < 1e-1
    assert float(jnp.max(jnp.abs(attn_bf - ref_attn))) < 1e-1

    print("KERNEL_OK")
</pallas_src>

<mosaic_0001>
module attributes {stable_mosaic.version = 11 : i64} {
  func.func @_fused_attention_kernel(%arg0: i32, %arg1: memref<1x8x32xf32, #tpu.memory_space<vmem>>, %arg2: memref<32x96xf32, #tpu.memory_space<vmem>>, %arg3: memref<1x96xf32, #tpu.memory_space<vmem>>, %arg4: memref<32x32xf32, #tpu.memory_space<vmem>>, %arg5: memref<1x32xf32, #tpu.memory_space<vmem>>, %arg6: memref<1x8x32xf32, #tpu.memory_space<vmem>>, %arg7: memref<1x8x8x8xf32, #tpu.memory_space<vmem>>, %arg8: memref<8x32xf32, #tpu.memory_space<vmem>>) attributes {dimension_semantics = [#tpu.dimension_semantics<parallel>], iteration_bounds = array<i64: 2>, scalar_prefetch = 0 : i64, scratch_operands = 1 : i64, tpu.core_type = #tpu.core_type<tc>, window_params = [{transform_indices = @transform_0, window_bounds = array<i64: 1, 8, 32>}, {pipeline_mode = #tpu.pipeline_mode<synchronous>, transform_indices = @transform_1, window_bounds = array<i64: 32, 96>}, {pipeline_mode = #tpu.pipeline_mode<synchronous>, transform_indices = @transform_2, window_bounds = array<i64: 1, 96>}, {pipeline_mode = #tpu.pipeline_mode<synchronous>, transform_indices = @transform_3, window_bounds = array<i64: 32, 32>}, {pipeline_mode = #tpu.pipeline_mode<synchronous>, transform_indices = @transform_4, window_bounds = array<i64: 1, 32>}, {transform_indices = @transform_5, window_bounds = array<i64: 1, 8, 32>}, {transform_indices = @transform_6, window_bounds = array<i64: 1, 8, 8, 8>}]} {
    %c0 = arith.constant 0 : index
    %c0_0 = arith.constant 0 : index
    %c0_1 = arith.constant 0 : index
    %0 = vector.load %arg1[%c0, %c0_0, %c0_1] : memref<1x8x32xf32, #tpu.memory_space<vmem>>, vector<1x8x32xf32>
    %1 = vector.shape_cast %0 : vector<1x8x32xf32> to vector<8x32xf32>
    %c0_2 = arith.constant 0 : index
    %c0_3 = arith.constant 0 : index
    %2 = vector.load %arg2[%c0_2, %c0_3] : memref<32x96xf32, #tpu.memory_space<vmem>>, vector<32x96xf32>
    %cst = arith.constant dense<0.000000e+00> : vector<8x96xf32>
    %3 = tpu.matmul %1, %2, %cst {dimension_numbers = #tpu.dot_dimension_numbers<[1], [0], [0], [1], [0, 0, 1, 1], [], []>} : vector<8x32xf32>, vector<32x96xf32>, vector<8x96xf32> -> vector<8x96xf32>
    %c0_4 = arith.constant 0 : index
    %c0_5 = arith.constant 0 : index
    %4 = vector.load %arg3[%c0_4, %c0_5] : memref<1x96xf32, #tpu.memory_space<vmem>>, vector<1x96xf32>
    %5 = vector.broadcast %4 : vector<1x96xf32> to vector<8x96xf32>
    %6 = arith.addf %3, %5 : vector<8x96xf32>
    %7 = vector.extract_strided_slice %6 {offsets = [0, 0], sizes = [8, 32], strides = [1, 1]} : vector<8x96xf32> to vector<8x32xf32>
    %cst_6 = arith.constant 5.000000e-01 : f32
    %8 = vector.broadcast %cst_6 : f32 to vector<8x32xf32>
    %9 = arith.mulf %7, %8 : vector<8x32xf32>
    %10 = vector.extract_strided_slice %6 {offsets = [0, 32], sizes = [8, 32], strides = [1, 1]} : vector<8x96xf32> to vector<8x32xf32>
    %11 = vector.extract_strided_slice %6 {offsets = [0, 64], sizes = [8, 32], strides = [1, 1]} : vector<8x96xf32> to vector<8x32xf32>
    %12 = vector.extract_strided_slice %9 {offsets = [0, 0], sizes = [8, 4], strides = [1, 1]} : vector<8x32xf32> to vector<8x4xf32>
    %13 = vector.extract_strided_slice %10 {offsets = [0, 0], sizes = [8, 4], strides = [1, 1]} : vector<8x32xf32> to vector<8x4xf32>
    %14 = vector.extract_strided_slice %11 {offsets = [0, 0], sizes = [8, 4], strides = [1, 1]} : vector<8x32xf32> to vector<8x4xf32>
    %cst_7 = arith.constant dense<0.000000e+00> : vector<8x8xf32>
    %15 = tpu.matmul %12, %13, %cst_7 {dimension_numbers = #tpu.dot_dimension_numbers<[1], [1], [0], [0], [0, 0, 1, 0], [], []>} : vector<8x4xf32>, vector<8x4xf32>, vector<8x8xf32> -> vector<8x8xf32>
    %cst_8 = arith.constant dense<0xFF800000> : vector<8xf32>
    %16 = vector.multi_reduction <maximumf>, %15, %cst_8 [1] : vector<8x8xf32> to vector<8xf32>
    %17 = vector.shape_cast %16 : vector<8xf32> to vector<8x1xf32>
    %18 = vector.broadcast %17 : vector<8x1xf32> to vector<8x8xf32>
    %19 = arith.subf %15, %18 : vector<8x8xf32>
    %20 = math.exp %19 : vector<8x8xf32>
    %cst_9 = arith.constant dense<0.000000e+00> : vector<8xf32>
    %21 = vector.multi_reduction <add>, %20, %cst_9 [1] : vector<8x8xf32> to vector<8xf32>
    %22 = vector.shape_cast %21 : vector<8xf32> to vector<8x1xf32>
    %23 = tpu.reciprocal %22 : vector<8x1xf32> -> vector<8x1xf32>
    %24 = vector.broadcast %23 : vector<8x1xf32> to vector<8x8xf32>
    %25 = arith.mulf %20, %24 : vector<8x8xf32>
    %c0_10 = arith.constant 0 : index
    %c0_11 = arith.constant 0 : index
    %c0_12 = arith.constant 0 : index
    %c0_13 = arith.constant 0 : index
    %26 = vector.load %arg7[%c0_10, %c0_11, %c0_12, %c0_13] : memref<1x8x8x8xf32, #tpu.memory_space<vmem>>, vector<1x1x8x8xf32>
    %27 = vector.shape_cast %26 : vector<1x1x8x8xf32> to vector<8x8xf32>
    %28 = vector.shape_cast %25 : vector<8x8xf32> to vector<1x1x8x8xf32>
    tpu.vector_store %arg7[%c0_10, %c0_11, %c0_12, %c0_13], %28 {strides = array<i32>} : memref<1x8x8x8xf32, #tpu.memory_space<vmem>>, vector<1x1x8x8xf32>,
    %cst_14 = arith.constant dense<0.000000e+00> : vector<8x4xf32>
    %29 = tpu.matmul %25, %14, %cst_14 {dimension_numbers = #tpu.dot_dimension_numbers<[1], [0], [0], [1], [0, 0, 1, 1], [], []>} : vector<8x8xf32>, vector<8x4xf32>, vector<8x4xf32> -> vector<8x4xf32>
    %c0_15 = arith.constant 0 : index
    %c0_16 = arith.constant 0 : index
    %30 = vector.load %arg8[%c0_15, %c0_16] : memref<8x32xf32, #tpu.memory_space<vmem>>, vector<8x4xf32>
    tpu.vector_store %arg8[%c0_15, %c0_16], %29 {strides = array<i32>} : memref<8x32xf32, #tpu.memory_space<vmem>>, vector<8x4xf32>,
    %31 = vector.extract_strided_slice %9 {offsets = [0, 4], sizes = [8, 4], strides = [1, 1]} : vector<8x32xf32> to vector<8x4xf32>
    %32 = vector.extract_strided_slice %10 {offsets = [0, 4], sizes = [8, 4], strides = [1, 1]} : vector<8x32xf32> to vector<8x4xf32>
    %33 = vector.extract_strided_slice %11 {offsets = [0, 4], sizes = [8, 4], strides = [1, 1]} : vector<8x32xf32> to vector<8x4xf32>
    %cst_17 = arith.constant dense<0.000000e+00> : vector<8x8xf32>
    %34 = tpu.matmul %31, %32, %cst_17 {dimension_numbers = #tpu.dot_dimension_numbers<[1], [1], [0], [0], [0, 0, 1, 0], [], []>} : vector<8x4xf32>, vector<8x4xf32>, vector<8x8xf32> -> vector<8x8xf32>
    %cst_18 = arith.constant dense<0xFF800000> : vector<8xf32>
    %35 = vector.multi_reduction <maximumf>, %34, %cst_18 [1] : vector<8x8xf32> to vector<8xf32>
    %36 = vector.shape_cast %35 : vector<8xf32> to vector<8x1xf32>
    %37 = vector.broadcast %36 : vector<8x1xf32> to vector<8x8xf32>
    %38 = arith.subf %34, %37 : vector<8x8xf32>
    %39 = math.exp %38 : vector<8x8xf32>
    %cst_19 = arith.constant dense<0.000000e+00> : vector<8xf32>
    %40 = vector.multi_reduction <add>, %39, %cst_19 [1] : vector<8x8xf32> to vector<8xf32>
    %41 = vector.shape_cast %40 : vector<8xf32> to vector<8x1xf32>
    %42 = tpu.reciprocal %41 : vector<8x1xf32> -> vector<8x1xf32>
    %43 = vector.broadcast %42 : vector<8x1xf32> to vector<8x8xf32>
    %44 = arith.mulf %39, %43 : vector<8x8xf32>
    %c0_20 = arith.constant 0 : index
    %c1 = arith.constant 1 : index
    %c0_21 = arith.constant 0 : index
    %c0_22 = arith.constant 0 : index
    %45 = vector.load %arg7[%c0_20, %c1, %c0_21, %c0_22] : memref<1x8x8x8xf32, #tpu.memory_space<vmem>>, vector<1x1x8x8xf32>
    %46 = vector.shape_cast %45 : vector<1x1x8x8xf32> to vector<8x8xf32>
    %47 = vector.shape_cast %44 : vector<8x8xf32> to vector<1x1x8x8xf32>
    tpu.vector_store %arg7[%c0_20, %c1, %c0_21, %c0_22], %47 {strides = array<i32>} : memref<1x8x8x8xf32, #tpu.memory_space<vmem>>, vector<1x1x8x8xf32>,
    %cst_23 = arith.constant dense<0.000000e+00> : vector<8x4xf32>
    %48 = tpu.matmul %44, %33, %cst_23 {dimension_numbers = #tpu.dot_dimension_numbers<[1], [0], [0], [1], [0, 0, 1, 1], [], []>} : vector<8x8xf32>, vector<8x4xf32>, vector<8x4xf32> -> vector<8x4xf32>
    %c0_24 = arith.constant 0 : index
    %c4 = arith.constant 4 : index
    %49 = vector.load %arg8[%c0_24, %c4] : memref<8x32xf32, #tpu.memory_space<vmem>>, vector<8x4xf32>
    tpu.vector_store %arg8[%c0_24, %c4], %48 {strides = array<i32>} : memref<8x32xf32, #tpu.memory_space<vmem>>, vector<8x4xf32>,
    %50 = vector.extract_strided_slice %9 {offsets = [0, 8], sizes = [8, 4], strides = [1, 1]} : vector<8x32xf32> to vector<8x4xf32>
    %51 = vector.extract_strided_slice %10 {offsets = [0, 8], sizes = [8, 4], strides = [1, 1]} : vector<8x32xf32> to vector<8x4xf32>
    %52 = vector.extract_strided_slice %11 {offsets = [0, 8], sizes = [8, 4], strides = [1, 1]} : vector<8x32xf32> to vector<8x4xf32>
    %cst_25 = arith.constant dense<0.000000e+00> : vector<8x8xf32>
    %53 = tpu.matmul %50, %51, %cst_25 {dimension_numbers = #tpu.dot_dimension_numbers<[1], [1], [0], [0], [0, 0, 1, 0], [], []>} : vector<8x4xf32>, vector<8x4xf32>, vector<8x8xf32> -> vector<8x8xf32>
    %cst_26 = arith.constant dense<0xFF800000> : vector<8xf32>
    %54 = vector.multi_reduction <maximumf>, %53, %cst_26 [1] : vector<8x8xf32> to vector<8xf32>
    %55 = vector.shape_cast %54 : vector<8xf32> to vector<8x1xf32>
    %56 = vector.broadcast %55 : vector<8x1xf32> to vector<8x8xf32>
    %57 = arith.subf %53, %56 : vector<8x8xf32>
    %58 = math.exp %57 : vector<8x8xf32>
    %cst_27 = arith.constant dense<0.000000e+00> : vector<8xf32>
    %59 = vector.multi_reduction <add>, %58, %cst_27 [1] : vector<8x8xf32> to vector<8xf32>
    %60 = vector.shape_cast %59 : vector<8xf32> to vector<8x1xf32>
    %61 = tpu.reciprocal %60 : vector<8x1xf32> -> vector<8x1xf32>
    %62 = vector.broadcast %61 : vector<8x1xf32> to vector<8x8xf32>
    %63 = arith.mulf %58, %62 : vector<8x8xf32>
    %c0_28 = arith.constant 0 : index
    %c2 = arith.constant 2 : index
    %c0_29 = arith.constant 0 : index
    %c0_30 = arith.constant 0 : index
    %64 = vector.load %arg7[%c0_28, %c2, %c0_29, %c0_30] : memref<1x8x8x8xf32, #tpu.memory_space<vmem>>, vector<1x1x8x8xf32>
    %65 = vector.shape_cast %64 : vector<1x1x8x8xf32> to vector<8x8xf32>
    %66 = vector.shape_cast %63 : vector<8x8xf32> to vector<1x1x8x8xf32>
    tpu.vector_store %arg7[%c0_28, %c2, %c0_29, %c0_30], %66 {strides = array<i32>} : memref<1x8x8x8xf32, #tpu.memory_space<vmem>>, vector<1x1x8x8xf32>,
    %cst_31 = arith.constant dense<0.000000e+00> : vector<8x4xf32>
    %67 = tpu.matmul %63, %52, %cst_31 {dimension_numbers = #tpu.dot_dimension_numbers<[1], [0], [0], [1], [0, 0, 1, 1], [], []>} : vector<8x8xf32>, vector<8x4xf32>, vector<8x4xf32> -> vector<8x4xf32>
    %c0_32 = arith.constant 0 : index
    %c8 = arith.constant 8 : index
    %68 = vector.load %arg8[%c0_32, %c8] : memref<8x32xf32, #tpu.memory_space<vmem>>, vector<8x4xf32>
    tpu.vector_store %arg8[%c0_32, %c8], %67 {strides = array<i32>} : memref<8x32xf32, #tpu.memory_space<vmem>>, vector<8x4xf32>,
    %69 = vector.extract_strided_slice %9 {offsets = [0, 12], sizes = [8, 4], strides = [1, 1]} : vector<8x32xf32> to vector<8x4xf32>
    %70 = vector.extract_strided_slice %10 {offsets = [0, 12], sizes = [8, 4], strides = [1, 1]} : vector<8x32xf32> to vector<8x4xf32>
    %71 = vector.extract_strided_slice %11 {offsets = [0, 12], sizes = [8, 4], strides = [1, 1]} : vector<8x32xf32> to vector<8x4xf32>
    %cst_33 = arith.constant dense<0.000000e+00> : vector<8x8xf32>
    %72 = tpu.matmul %69, %70, %cst_33 {dimension_numbers = #tpu.dot_dimension_numbers<[1], [1], [0], [0], [0, 0, 1, 0], [], []>} : vector<8x4xf32>, vector<8x4xf32>, vector<8x8xf32> -> vector<8x8xf32>
    %cst_34 = arith.constant dense<0xFF800000> : vector<8xf32>
    %73 = vector.multi_reduction <maximumf>, %72, %cst_34 [1] : vector<8x8xf32> to vector<8xf32>
    %74 = vector.shape_cast %73 : vector<8xf32> to vector<8x1xf32>
    %75 = vector.broadcast %74 : vector<8x1xf32> to vector<8x8xf32>
    %76 = arith.subf %72, %75 : vector<8x8xf32>
    %77 = math.exp %76 : vector<8x8xf32>
    %cst_35 = arith.constant dense<0.000000e+00> : vector<8xf32>
    %78 = vector.multi_reduction <add>, %77, %cst_35 [1] : vector<8x8xf32> to vector<8xf32>
    %79 = vector.shape_cast %78 : vector<8xf32> to vector<8x1xf32>
    %80 = tpu.reciprocal %79 : vector<8x1xf32> -> vector<8x1xf32>
    %81 = vector.broadcast %80 : vector<8x1xf32> to vector<8x8xf32>
    %82 = arith.mulf %77, %81 : vector<8x8xf32>
    %c0_36 = arith.constant 0 : index
    %c3 = arith.constant 3 : index
    %c0_37 = arith.constant 0 : index
    %c0_38 = arith.constant 0 : index
    %83 = vector.load %arg7[%c0_36, %c3, %c0_37, %c0_38] : memref<1x8x8x8xf32, #tpu.memory_space<vmem>>, vector<1x1x8x8xf32>
    %84 = vector.shape_cast %83 : vector<1x1x8x8xf32> to vector<8x8xf32>
    %85 = vector.shape_cast %82 : vector<8x8xf32> to vector<1x1x8x8xf32>
    tpu.vector_store %arg7[%c0_36, %c3, %c0_37, %c0_38], %85 {strides = array<i32>} : memref<1x8x8x8xf32, #tpu.memory_space<vmem>>, vector<1x1x8x8xf32>,
    %cst_39 = arith.constant dense<0.000000e+00> : vector<8x4xf32>
    %86 = tpu.matmul %82, %71, %cst_39 {dimension_numbers = #tpu.dot_dimension_numbers<[1], [0], [0], [1], [0, 0, 1, 1], [], []>} : vector<8x8xf32>, vector<8x4xf32>, vector<8x4xf32> -> vector<8x4xf32>
    %c0_40 = arith.constant 0 : index
    %c12 = arith.constant 12 : index
    %87 = vector.load %arg8[%c0_40, %c12] : memref<8x32xf32, #tpu.memory_space<vmem>>, vector<8x4xf32>
    tpu.vector_store %arg8[%c0_40, %c12], %86 {strides = array<i32>} : memref<8x32xf32, #tpu.memory_space<vmem>>, vector<8x4xf32>,
    %88 = vector.extract_strided_slice %9 {offsets = [0, 16], sizes = [8, 4], strides = [1, 1]} : vector<8x32xf32> to vector<8x4xf32>
    %89 = vector.extract_strided_slice %10 {offsets = [0, 16], sizes = [8, 4], strides = [1, 1]} : vector<8x32xf32> to vector<8x4xf32>
    %90 = vector.extract_strided_slice %11 {offsets = [0, 16], sizes = [8, 4], strides = [1, 1]} : vector<8x32xf32> to vector<8x4xf32>
    %cst_41 = arith.constant dense<0.000000e+00> : vector<8x8xf32>
    %91 = tpu.matmul %88, %89, %cst_41 {dimension_numbers = #tpu.dot_dimension_numbers<[1], [1], [0], [0], [0, 0, 1, 0], [], []>} : vector<8x4xf32>, vector<8x4xf32>, vector<8x8xf32> -> vector<8x8xf32>
    %cst_42 = arith.constant dense<0xFF800000> : vector<8xf32>
    %92 = vector.multi_reduction <maximumf>, %91, %cst_42 [1] : vector<8x8xf32> to vector<8xf32>
    %93 = vector.shape_cast %92 : vector<8xf32> to vector<8x1xf32>
    %94 = vector.broadcast %93 : vector<8x1xf32> to vector<8x8xf32>
    %95 = arith.subf %91, %94 : vector<8x8xf32>
    %96 = math.exp %95 : vector<8x8xf32>
    %cst_43 = arith.constant dense<0.000000e+00> : vector<8xf32>
    %97 = vector.multi_reduction <add>, %96, %cst_43 [1] : vector<8x8xf32> to vector<8xf32>
    %98 = vector.shape_cast %97 : vector<8xf32> to vector<8x1xf32>
    %99 = tpu.reciprocal %98 : vector<8x1xf32> -> vector<8x1xf32>
    %100 = vector.broadcast %99 : vector<8x1xf32> to vector<8x8xf32>
    %101 = arith.mulf %96, %100 : vector<8x8xf32>
    %c0_44 = arith.constant 0 : index
    %c4_45 = arith.constant 4 : index
    %c0_46 = arith.constant 0 : index
    %c0_47 = arith.constant 0 : index
    %102 = vector.load %arg7[%c0_44, %c4_45, %c0_46, %c0_47] : memref<1x8x8x8xf32, #tpu.memory_space<vmem>>, vector<1x1x8x8xf32>
    %103 = vector.shape_cast %102 : vector<1x1x8x8xf32> to vector<8x8xf32>
    %104 = vector.shape_cast %101 : vector<8x8xf32> to vector<1x1x8x8xf32>
    tpu.vector_store %arg7[%c0_44, %c4_45, %c0_46, %c0_47], %104 {strides = array<i32>} : memref<1x8x8x8xf32, #tpu.memory_space<vmem>>, vector<1x1x8x8xf32>,
    %cst_48 = arith.constant dense<0.000000e+00> : vector<8x4xf32>
    %105 = tpu.matmul %101, %90, %cst_48 {dimension_numbers = #tpu.dot_dimension_numbers<[1], [0], [0], [1], [0, 0, 1, 1], [], []>} : vector<8x8xf32>, vector<8x4xf32>, vector<8x4xf32> -> vector<8x4xf32>
    %c0_49 = arith.constant 0 : index
    %c16 = arith.constant 16 : index
    %106 = vector.load %arg8[%c0_49, %c16] : memref<8x32xf32, #tpu.memory_space<vmem>>, vector<8x4xf32>
    tpu.vector_store %arg8[%c0_49, %c16], %105 {strides = array<i32>} : memref<8x32xf32, #tpu.memory_space<vmem>>, vector<8x4xf32>,
    %107 = vector.extract_strided_slice %9 {offsets = [0, 20], sizes = [8, 4], strides = [1, 1]} : vector<8x32xf32> to vector<8x4xf32>
    %108 = vector.extract_strided_slice %10 {offsets = [0, 20], sizes = [8, 4], strides = [1, 1]} : vector<8x32xf32> to vector<8x4xf32>
    %109 = vector.extract_strided_slice %11 {offsets = [0, 20], sizes = [8, 4], strides = [1, 1]} : vector<8x32xf32> to vector<8x4xf32>
    %cst_50 = arith.constant dense<0.000000e+00> : vector<8x8xf32>
    %110 = tpu.matmul %107, %108, %cst_50 {dimension_numbers = #tpu.dot_dimension_numbers<[1], [1], [0], [0], [0, 0, 1, 0], [], []>} : vector<8x4xf32>, vector<8x4xf32>, vector<8x8xf32> -> vector<8x8xf32>
    %cst_51 = arith.constant dense<0xFF800000> : vector<8xf32>
    %111 = vector.multi_reduction <maximumf>, %110, %cst_51 [1] : vector<8x8xf32> to vector<8xf32>
    %112 = vector.shape_cast %111 : vector<8xf32> to vector<8x1xf32>
    %113 = vector.broadcast %112 : vector<8x1xf32> to vector<8x8xf32>
    %114 = arith.subf %110, %113 : vector<8x8xf32>
    %115 = math.exp %114 : vector<8x8xf32>
    %cst_52 = arith.constant dense<0.000000e+00> : vector<8xf32>
    %116 = vector.multi_reduction <add>, %115, %cst_52 [1] : vector<8x8xf32> to vector<8xf32>
    %117 = vector.shape_cast %116 : vector<8xf32> to vector<8x1xf32>
    %118 = tpu.reciprocal %117 : vector<8x1xf32> -> vector<8x1xf32>
    %119 = vector.broadcast %118 : vector<8x1xf32> to vector<8x8xf32>
    %120 = arith.mulf %115, %119 : vector<8x8xf32>
    %c0_53 = arith.constant 0 : index
    %c5 = arith.constant 5 : index
    %c0_54 = arith.constant 0 : index
    %c0_55 = arith.constant 0 : index
    %121 = vector.load %arg7[%c0_53, %c5, %c0_54, %c0_55] : memref<1x8x8x8xf32, #tpu.memory_space<vmem>>, vector<1x1x8x8xf32>
    %122 = vector.shape_cast %121 : vector<1x1x8x8xf32> to vector<8x8xf32>
    %123 = vector.shape_cast %120 : vector<8x8xf32> to vector<1x1x8x8xf32>
    tpu.vector_store %arg7[%c0_53, %c5, %c0_54, %c0_55], %123 {strides = array<i32>} : memref<1x8x8x8xf32, #tpu.memory_space<vmem>>, vector<1x1x8x8xf32>,
    %cst_56 = arith.constant dense<0.000000e+00> : vector<8x4xf32>
    %124 = tpu.matmul %120, %109, %cst_56 {dimension_numbers = #tpu.dot_dimension_numbers<[1], [0], [0], [1], [0, 0, 1, 1], [], []>} : vector<8x8xf32>, vector<8x4xf32>, vector<8x4xf32> -> vector<8x4xf32>
    %c0_57 = arith.constant 0 : index
    %c20 = arith.constant 20 : index
    %125 = vector.load %arg8[%c0_57, %c20] : memref<8x32xf32, #tpu.memory_space<vmem>>, vector<8x4xf32>
    tpu.vector_store %arg8[%c0_57, %c20], %124 {strides = array<i32>} : memref<8x32xf32, #tpu.memory_space<vmem>>, vector<8x4xf32>,
    %126 = vector.extract_strided_slice %9 {offsets = [0, 24], sizes = [8, 4], strides = [1, 1]} : vector<8x32xf32> to vector<8x4xf32>
    %127 = vector.extract_strided_slice %10 {offsets = [0, 24], sizes = [8, 4], strides = [1, 1]} : vector<8x32xf32> to vector<8x4xf32>
    %128 = vector.extract_strided_slice %11 {offsets = [0, 24], sizes = [8, 4], strides = [1, 1]} : vector<8x32xf32> to vector<8x4xf32>
    %cst_58 = arith.constant dense<0.000000e+00> : vector<8x8xf32>
    %129 = tpu.matmul %126, %127, %cst_58 {dimension_numbers = #tpu.dot_dimension_numbers<[1], [1], [0], [0], [0, 0, 1, 0], [], []>} : vector<8x4xf32>, vector<8x4xf32>, vector<8x8xf32> -> vector<8x8xf32>
    %cst_59 = arith.constant dense<0xFF800000> : vector<8xf32>
    %130 = vector.multi_reduction <maximumf>, %129, %cst_59 [1] : vector<8x8xf32> to vector<8xf32>
    %131 = vector.shape_cast %130 : vector<8xf32> to vector<8x1xf32>
    %132 = vector.broadcast %131 : vector<8x1xf32> to vector<8x8xf32>
    %133 = arith.subf %129, %132 : vector<8x8xf32>
    %134 = math.exp %133 : vector<8x8xf32>
    %cst_60 = arith.constant dense<0.000000e+00> : vector<8xf32>
    %135 = vector.multi_reduction <add>, %134, %cst_60 [1] : vector<8x8xf32> to vector<8xf32>
    %136 = vector.shape_cast %135 : vector<8xf32> to vector<8x1xf32>
    %137 = tpu.reciprocal %136 : vector<8x1xf32> -> vector<8x1xf32>
    %138 = vector.broadcast %137 : vector<8x1xf32> to vector<8x8xf32>
    %139 = arith.mulf %134, %138 : vector<8x8xf32>
    %c0_61 = arith.constant 0 : index
    %c6 = arith.constant 6 : index
    %c0_62 = arith.constant 0 : index
    %c0_63 = arith.constant 0 : index
    %140 = vector.load %arg7[%c0_61, %c6, %c0_62, %c0_63] : memref<1x8x8x8xf32, #tpu.memory_space<vmem>>, vector<1x1x8x8xf32>
    %141 = vector.shape_cast %140 : vector<1x1x8x8xf32> to vector<8x8xf32>
    %142 = vector.shape_cast %139 : vector<8x8xf32> to vector<1x1x8x8xf32>
    tpu.vector_store %arg7[%c0_61, %c6, %c0_62, %c0_63], %142 {strides = array<i32>} : memref<1x8x8x8xf32, #tpu.memory_space<vmem>>, vector<1x1x8x8xf32>,
    %cst_64 = arith.constant dense<0.000000e+00> : vector<8x4xf32>
    %143 = tpu.matmul %139, %128, %cst_64 {dimension_numbers = #tpu.dot_dimension_numbers<[1], [0], [0], [1], [0, 0, 1, 1], [], []>} : vector<8x8xf32>, vector<8x4xf32>, vector<8x4xf32> -> vector<8x4xf32>
    %c0_65 = arith.constant 0 : index
    %c24 = arith.constant 24 : index
    %144 = vector.load %arg8[%c0_65, %c24] : memref<8x32xf32, #tpu.memory_space<vmem>>, vector<8x4xf32>
    tpu.vector_store %arg8[%c0_65, %c24], %143 {strides = array<i32>} : memref<8x32xf32, #tpu.memory_space<vmem>>, vector<8x4xf32>,
    %145 = vector.extract_strided_slice %9 {offsets = [0, 28], sizes = [8, 4], strides = [1, 1]} : vector<8x32xf32> to vector<8x4xf32>
    %146 = vector.extract_strided_slice %10 {offsets = [0, 28], sizes = [8, 4], strides = [1, 1]} : vector<8x32xf32> to vector<8x4xf32>
    %147 = vector.extract_strided_slice %11 {offsets = [0, 28], sizes = [8, 4], strides = [1, 1]} : vector<8x32xf32> to vector<8x4xf32>
    %cst_66 = arith.constant dense<0.000000e+00> : vector<8x8xf32>
    %148 = tpu.matmul %145, %146, %cst_66 {dimension_numbers = #tpu.dot_dimension_numbers<[1], [1], [0], [0], [0, 0, 1, 0], [], []>} : vector<8x4xf32>, vector<8x4xf32>, vector<8x8xf32> -> vector<8x8xf32>
    %cst_67 = arith.constant dense<0xFF800000> : vector<8xf32>
    %149 = vector.multi_reduction <maximumf>, %148, %cst_67 [1] : vector<8x8xf32> to vector<8xf32>
    %150 = vector.shape_cast %149 : vector<8xf32> to vector<8x1xf32>
    %151 = vector.broadcast %150 : vector<8x1xf32> to vector<8x8xf32>
    %152 = arith.subf %148, %151 : vector<8x8xf32>
    %153 = math.exp %152 : vector<8x8xf32>
    %cst_68 = arith.constant dense<0.000000e+00> : vector<8xf32>
    %154 = vector.multi_reduction <add>, %153, %cst_68 [1] : vector<8x8xf32> to vector<8xf32>
    %155 = vector.shape_cast %154 : vector<8xf32> to vector<8x1xf32>
    %156 = tpu.reciprocal %155 : vector<8x1xf32> -> vector<8x1xf32>
    %157 = vector.broadcast %156 : vector<8x1xf32> to vector<8x8xf32>
    %158 = arith.mulf %153, %157 : vector<8x8xf32>
    %c0_69 = arith.constant 0 : index
    %c7 = arith.constant 7 : index
    %c0_70 = arith.constant 0 : index
    %c0_71 = arith.constant 0 : index
    %159 = vector.load %arg7[%c0_69, %c7, %c0_70, %c0_71] : memref<1x8x8x8xf32, #tpu.memory_space<vmem>>, vector<1x1x8x8xf32>
    %160 = vector.shape_cast %159 : vector<1x1x8x8xf32> to vector<8x8xf32>
    %161 = vector.shape_cast %158 : vector<8x8xf32> to vector<1x1x8x8xf32>
    tpu.vector_store %arg7[%c0_69, %c7, %c0_70, %c0_71], %161 {strides = array<i32>} : memref<1x8x8x8xf32, #tpu.memory_space<vmem>>, vector<1x1x8x8xf32>,
    %cst_72 = arith.constant dense<0.000000e+00> : vector<8x4xf32>
    %162 = tpu.matmul %158, %147, %cst_72 {dimension_numbers = #tpu.dot_dimension_numbers<[1], [0], [0], [1], [0, 0, 1, 1], [], []>} : vector<8x8xf32>, vector<8x4xf32>, vector<8x4xf32> -> vector<8x4xf32>
    %c0_73 = arith.constant 0 : index
    %c28 = arith.constant 28 : index
    %163 = vector.load %arg8[%c0_73, %c28] : memref<8x32xf32, #tpu.memory_space<vmem>>, vector<8x4xf32>
    tpu.vector_store %arg8[%c0_73, %c28], %162 {strides = array<i32>} : memref<8x32xf32, #tpu.memory_space<vmem>>, vector<8x4xf32>,
    %c0_74 = arith.constant 0 : index
    %c0_75 = arith.constant 0 : index
    %164 = vector.load %arg8[%c0_74, %c0_75] : memref<8x32xf32, #tpu.memory_space<vmem>>, vector<8x32xf32>
    %c0_76 = arith.constant 0 : index
    %c0_77 = arith.constant 0 : index
    %165 = vector.load %arg4[%c0_76, %c0_77] : memref<32x32xf32, #tpu.memory_space<vmem>>, vector<32x32xf32>
    %cst_78 = arith.constant dense<0.000000e+00> : vector<8x32xf32>
    %166 = tpu.matmul %164, %165, %cst_78 {dimension_numbers = #tpu.dot_dimension_numbers<[1], [0], [0], [1], [0, 0, 1, 1], [], []>} : vector<8x32xf32>, vector<32x32xf32>, vector<8x32xf32> -> vector<8x32xf32>
    %c0_79 = arith.constant 0 : index
    %c0_80 = arith.constant 0 : index
    %167 = vector.load %arg5[%c0_79, %c0_80] : memref<1x32xf32, #tpu.memory_space<vmem>>, vector<1x32xf32>
    %168 = vector.broadcast %167 : vector<1x32xf32> to vector<8x32xf32>
    %169 = arith.addf %166, %168 : vector<8x32xf32>
    %c0_81 = arith.constant 0 : index
    %c0_82 = arith.constant 0 : index
    %c0_83 = arith.constant 0 : index
    %170 = vector.load %arg6[%c0_81, %c0_82, %c0_83] : memref<1x8x32xf32, #tpu.memory_space<vmem>>, vector<1x8x32xf32>
    %171 = vector.shape_cast %170 : vector<1x8x32xf32> to vector<8x32xf32>
    %172 = vector.shape_cast %169 : vector<8x32xf32> to vector<1x8x32xf32>
    tpu.vector_store %arg6[%c0_81, %c0_82, %c0_83], %172 {strides = array<i32>} : memref<1x8x32xf32, #tpu.memory_space<vmem>>, vector<1x8x32xf32>,
    return
  }
  func.func @transform_0(%arg0: i32) -> (i32, i32, i32) {
    %c0_i32 = arith.constant 0 : i32
    %c0_i32_0 = arith.constant 0 : i32
    %c0_i32_1 = arith.constant 0 : i32
    return %arg0, %c0_i32, %c0_i32_0 : i32, i32, i32
  }
  func.func @transform_1(%arg0: i32) -> (i32, i32) {
    %c0_i32 = arith.constant 0 : i32
    %c0_i32_0 = arith.constant 0 : i32
    %c0_i32_1 = arith.constant 0 : i32
    return %c0_i32, %c0_i32_0 : i32, i32
  }
  func.func @transform_2(%arg0: i32) -> (i32, i32) {
    %c0_i32 = arith.constant 0 : i32
    %c0_i32_0 = arith.constant 0 : i32
    %c0_i32_1 = arith.constant 0 : i32
    return %c0_i32, %c0_i32_0 : i32, i32
  }
  func.func @transform_3(%arg0: i32) -> (i32, i32) {
    %c0_i32 = arith.constant 0 : i32
    %c0_i32_0 = arith.constant 0 : i32
    %c0_i32_1 = arith.constant 0 : i32
    return %c0_i32, %c0_i32_0 : i32, i32
  }
  func.func @transform_4(%arg0: i32) -> (i32, i32) {
    %c0_i32 = arith.constant 0 : i32
    %c0_i32_0 = arith.constant 0 : i32
    %c0_i32_1 = arith.constant 0 : i32
    return %c0_i32, %c0_i32_0 : i32, i32
  }
  func.func @transform_5(%arg0: i32) -> (i32, i32, i32) {
    %c0_i32 = arith.constant 0 : i32
    %c0_i32_0 = arith.constant 0 : i32
    %c0_i32_1 = arith.constant 0 : i32
    return %arg0, %c0_i32, %c0_i32_0 : i32, i32, i32
  }
  func.func @transform_6(%arg0: i32) -> (i32, i32, i32, i32) {
    %c0_i32 = arith.constant 0 : i32
    %c0_i32_0 = arith.constant 0 : i32
    %c0_i32_1 = arith.constant 0 : i32
    %c0_i32_2 = arith.constant 0 : i32
    return %arg0, %c0_i32, %c0_i32_0, %c0_i32_1 : i32, i32, i32, i32
  }
}

</mosaic_0001>

<bundles_post_ra>
// kernel: tpu_custom_call.1
= control target key start
LH: loop header
LB: loop body
LE: loop exit
PB: predicated region body
PF: predicated region fallthrough
CT: control target
= control target key end

     0   :  { %s2981_s0 = inlined_call_operand.hbm [shape: f32[2,8,32], index: 0, kind: input, shape index: {}]   ;;  %s2982_s1 = inlined_call_operand.hbm [shape: f32[32,96], index: 1, kind: input, shape index: {}]   ;;  %s2983_s2 = inlined_call_operand.vmem [shape: f32[1,96], index: 2, kind: input, shape index: {}]   ;;  %s2984_s3 = inlined_call_operand.hbm [shape: f32[32,32], index: 3, kind: input, shape index: {}]   ;;  %s2985_s4 = inlined_call_operand.vmem [shape: f32[1,32], index: 4, kind: input, shape index: {}]   ;;  %s2986_s5 = inlined_call_operand.hbm [shape: f32[2,8,32], index: 5, kind: output, shape index: {0}]   ;;  %s2987_s6 = inlined_call_operand.hbm [shape: f32[2,8,8,8], index: 6, kind: output, shape index: {1}]  }
   0x1   :  { %2992 = sst [smem:[#allocation16_spill]] %s2982_s1 }
   0x2   :  { %12 = vsyncpa [#allocation4], 0 }
   0x3   :  { %14 = vsyncpa [#allocation4 + $0x1], 0 }
   0x4   :  { %15 = vsyncpa [#allocation7], 0 }
   0x5   :  { %16 = vsyncpa [#allocation5], 0 }
   0x6   :  { %18 = vsyncpa [#allocation5 + $0x1], 0 }
   0x7   :  { %19 = vsyncpa [#allocation11], 0 }
   0x8   :  { %21 = vsyncpa [#allocation11 + $0x1], 0  ;;  %s2610_s21 = smov 0   ;;  %s2612_s22 = smov 0  }
   0x9   :  { %s2614_s23 = smov 0   ;;  %s2616_s24 = smov 0  }
   0xa LB: > { %s2631_s25 = sadd.s32 4294967295, %s2533_s24   ;;  %s2016_s26 = sadd.s32 4294967294, %s2533_s24   ;;  %s2533_s24 = sphi %s2616_s24, %s3011_s24   ;;  %s2529_s23 = sphi %s2614_s23, %s3010_s23   ;;  %s2525_s22 = sphi %s2612_s22, %s3009_s22   ;;  %s2521_s21 = sphi %s2610_s21, %s3008_s21  }
   0xb   : > { %p47_p0 = scmp.ne.s32.totalorder %s2525_s22, %s2521_s21  ;;  %p2988_p1 = scmp.eq.s32.totalorder %s2631_s25, 0 }
   0xc   : > { %p161_p3 = scmp.eq.s32.totalorder %s2016_s26, 1  ;;  %p2017_p5 = scmp.ge.s32.totalorder %s2533_s24, 1 }
   0xd   : > { %p2640_p4 = por %p2988_p1, %p47_p0  ;;  %p194_p7 = scmp.lt.s32.totalorder %s2533_s24, 3 }
   0xe   : > { %p2645_p6 = por %p161_p3, %p47_p0  ;;  %s2535_s30 = smov [#allocation6]  }
   0xf   : > { %s2993_s27 = scalar_select %p2640_p4, 1, 0 }
  0x10   : > { %s2994_s28 = scalar_select %p2645_p6, 1, 0 }
  0x11   : > { %p2650_p8 = pnand %p2017_p5, %p194_p7  ;;  %s206_s7 = sshll.u32 %s2535_s30, 4  ;;  %s207_s7 = int_to_ptr.vmem [resolvable:$true] %s206_s7 }
  0x12   : > { %s2536_s9 = smov [#allocation8]   ;;  %s2366_s11 = scalar_lea.vmem %s207_s7, 512 }
  0x13   : > { %s2995_s29 = scalar_select %p2650_p8, 1, 0 }
  0x14   : > { %p2230_p9 = pneg %p2650_p8  ;;  %s222_s10 = sshll.u32 %s2536_s9, 4  ;;  %s223_s10 = int_to_ptr.vmem [resolvable:$true] %s222_s10 }
  0x15   : > { %p2367_p13 = scmp.ne.s32.totalorder %s207_s7, %s2366_s11  ;;  %p2374_p5 = scmp.lt.s32.totalorder %s207_s7, %s207_s7 }
  0x16   : > { %p2659_p11 = pnand %p2230_p9, %p2988_p1  ;;  %p2375_p7 = scmp.lt.s32.totalorder %s2366_s11, %s2366_s11 }
  0x18   : > { %p2357_p12 = pneg %p2659_p11  ;;  %p2376_p10 = por %p2375_p7, %p2374_p5 }
  0x1a   : > { %p2369_p0 = pnand %p2367_p13, %p2357_p12 }
  0x1c   : > { %p2370_p3 = pneg %p2369_p0 }
  0x1e   : > { %p2377_p9 = pnand %p2376_p10, %p2370_p3 }
  0x20   : > { %2380 = shalt.err (!%p2377_p9)
}
  0x21   : > { %s2537_s12 = smov 128   ;;  %s2538_s13 = smov 8  }
  0x22   : > { %s2997_s1 = sld [smem:[#allocation16_spill]]  ;;  %s2392_s16 = scalar_lea.vmem %s223_s10, 512 }
  0x23   : > { %p2393_p1 = scmp.ne.s32.totalorder %s223_s10, %s2392_s16  ;;  %p2400_p2 = scmp.lt.s32.totalorder %s223_s10, %s223_s10 }
  0x24   : > { %p2401_p6 = scmp.lt.s32.totalorder %s2392_s16, %s2392_s16 }
  0x25   : > { %p2395_p13 = pnand %p2393_p1, %p2357_p12 }
  0x26   : > { %p2402_p5 = por %p2401_p6, %p2400_p2 }
  0x27   : > { %p2396_p0 = pneg %p2395_p13 }
  0x28   : > { %2233 = dma.hbm_to_vmem [thread:$0]  (!%p2659_p11), %s2997_s1, 512, %s207_s7, [#allocation7], %s2537_s12, %s2537_s12, %s2538_s13  }
  0x29   : > { %p2403_p10 = pnand %p2402_p5, %p2396_p0 }
  0x2b   : > { %2406 = shalt.err (!%p2403_p10)
}
  0x2c   : > { %2236 = dma.hbm_to_vmem [thread:$0]  (!%p2659_p11), %s2984_s3, 512, %s223_s10, [#allocation7], %s2537_s12, %s2537_s12, %s2538_s13  }
  0x2d   : > { %s2682_s19 = sadd.s32 1, %s2533_s24   ;;  %s34_s20 = sadd.s32 1, %s2529_s23 }
  0x2e   : > { %s31_s26 = ssub.s32 %s2533_s24, %s2682_s19  ;;  %p41_p1 = scmp.ne.s32.totalorder %s2529_s23, %s2525_s22 }
  0x2f   : > { %p32_p2 = scmp.eq.s32.totalorder %s31_s26, 0  ;;  %p42_p6 = scmp.eq.s32.totalorder %s2533_s24, 0 }
  0x30   : > { %p2998_p12 = scmp.eq.s32.totalorder %s2631_s25, 1  ;;  %p2250_p7 = scmp.lt.s32.totalorder %s2533_s24, 2 }
  0x31   : > { %s2698_s7 = scalar_select %p32_p2, %s2529_s23, %s34_s20  }
  0x32   : > { %p2692_p3 = por %p2998_p12, %p41_p1  ;;  %p43_p9 = por %p42_p6, %p41_p1 }
  0x33   : > { %s239_s8 = sand.u32 1, %s2529_s23   ;;  %s2022_s10 = sshll.u32 %s2533_s24, 7 }
  0x34   : > { %s2999_s30 = scalar_select %p2692_p3, 1, 0 }
  0x35   : > { %s2021_s9 = sshll.u32 %s239_s8, 3  ;;  %s2705_s13 = scalar_lea.hbm %s2981_s0, %s2022_s10 }
  0x36   : > { %s243_s14 = scalar_lea.vmem [#allocation3], %s2021_s9  ;;  %p2707_p11 = pnand %p2250_p7, %p43_p9 }
  0x37   : > { %s250_s15 = sshll.u32 %s243_s14, 4  ;;  %s240_s17 = scalar_lea.sflag [#allocation4], %s239_s8  ;;  %s251_s15 = int_to_ptr.vmem [resolvable:$true] %s250_s15 }
  0x38   : > { %s2407_s18 = scalar_lea.hbm %s2705_s13, 128  ;;  %p2409_p0 = pneg %p2707_p11 }
  0x39   : > { %p2408_p13 = scmp.ne.s32.totalorder %s2705_s13, %s2407_s18  ;;  %s2412_s10 = scalar_lea.hbm %s2981_s0, 256 }
  0x3a   : > { %p2413_p1 = scmp.lt.s32.totalorder %s2705_s13, %s2981_s0  ;;  %p2414_p2 = scmp.lt.s32.totalorder %s2412_s10, %s2407_s18 }
  0x3b   : > { %p2410_p5 = pnand %p2409_p0, %p2408_p13 }
  0x3c   : > { %p2415_p6 = por %p2414_p2, %p2413_p1 }
  0x3d   : > { %p2411_p10 = pneg %p2410_p5 }
  0x3f   : > { %p2416_p12 = pnand %p2415_p6, %p2411_p10 }
  0x41   : > { %2419 = shalt.err (!%p2416_p12)
}
  0x42   : > { %s2420_s12 = scalar_lea.vmem %s251_s15, 128  ;;  %s2539_s8 = smov [#allocation3]  }
  0x43   : > { %p2421_p7 = scmp.ne.s32.totalorder %s251_s15, %s2420_s12  ;;  %s2425_s14 = sshll.u32 %s2539_s8, 4  ;;  %s2426_s14 = int_to_ptr.vmem [resolvable:$false] %s2425_s14 }
  0x44   : > { %s2427_s1 = scalar_lea.vmem %s2426_s14, 256  ;;  %p2428_p13 = scmp.lt.s32.totalorder %s251_s15, %s2426_s14 }
  0x45   : > { %p2423_p9 = pnand %p2421_p7, %p2409_p0  ;;  %p2429_p5 = scmp.lt.s32.totalorder %s2427_s1, %s2420_s12 }
  0x47   : > { %p2424_p3 = pneg %p2423_p9  ;;  %p2430_p4 = por %p2429_p5, %p2428_p13 }
  0x49   : > { %p2431_p8 = pnand %p2430_p4, %p2424_p3 }
  0x4b   : > { %2434 = shalt.err (!%p2431_p8)
}
  0x4c   : > { %2240 = dma.hbm_to_vmem [thread:$0]  (!%p2707_p11), %s2705_s13, 128, %s251_s15, %s240_s17  }
  0x4d   : > { %p3001_p10 = scmp.ne.s32.totalorder %s2995_s29, 0 }
  0x4e   : > { %s2728_s18 = sand.u32 (!%p3001_p10), 1, %s2525_s22   ;;  %p3002_p4 = scmp.ne.s32.totalorder (!%p3001_p10), %s2993_s27, 0 }
  0x4f   : > { %259 = sbr.rel (%p3001_p10) target bundleno = 1989 (0x7c5), region = 40  ;;  %s2024_s20 = sshll.u32 (!%p3001_p10), %s2728_s18, 3 }
  0x50   : > { %s262_s26 = scalar_lea.sflag (!%p3001_p10), [#allocation4], %s2728_s18  ;;  %s265_s1 = scalar_lea.vmem (!%p3001_p10), [#allocation3], %s2024_s20 }
  0x54   : > { %2504 = dma.done.wait (%p3002_p4), %s262_s26, 128  }
  0x55   : > { %2506 = vsyncadd (%p3002_p4), %s262_s26, 4294967168  ;;  %p3003_p8 = scmp.eq.s32.totalorder %s2631_s25, 0 }
  0x57   : > { %2508 = dma.done.wait (%p3003_p8), [#allocation7], 1024   ;;  %p3004_p3 = pmov %p3003_p8 }
  0x58   : > { %v2540_v0 = vmov 0.0   ;;  %vm2541_vm0 = vmmov 0   ;;  %v311_v1 = vld [vmem:[#allocation6 + $0x18] sm:$0xff]  ;;  %v310_v2 = vld [vmem:[#allocation6 + $0x10] sm:$0xff]  ;;  %v309_v3 = vld [vmem:[#allocation6 + $0x8] sm:$0xff]  ;;  %vm319_vm1 = vcmask 261120  }
  0x59   : > { %2510 = vsyncadd (%p3004_p3), [#allocation7], 4294966272  ;;  %2114 = vmatprep.subr.mxu0 %v2540_v0  ;;  %2122 = vmatprep.mubr.msk.f32.mxu0 %vm2541_vm0, %v2540_v0  ;;  %v308_v4 = vld [vmem:[#allocation6] sm:$0xff]  ;;  %v307_v5 = vld [vmem:[%s265_s1] sm:$0xff]  ;;  %s2542_s13 = smov 64   ;;  %s2543_s15 = smov 96  }
  0x5a   : > { %2125 = vmatprep.subr.mxu1 %v2540_v0  ;;  %2127 = vmatprep.mubr.msk.f32.mxu1 %vm2541_vm0, %v2540_v0  ;;  %v2029_v6 = vld [vmem:[%s2983_s2] ss:$0 sm:$0xff]  ;;  %s2544_s16 = smov 92   ;;  %s2545_s17 = smov 124   ;;  %vm397_vm2 = vcmask 31744   ;;  %vm473_vm3 = vcmask 64512  }
  0x5b   : > { %2115 = vmatpush3.msra.mxu0 %v311_v1  ;;  %s2546_s10 = smov 88   ;;  %s2547_s11 = smov 120   ;;  %vm734_vm4 = vcmask 64544   ;;  %vm907_vm5 = vcmask 97344   ;;  %vm1080_vm6 = vcmask 130144   ;;  %vm1253_vm7 = vcmask 162944  }
  0x5c   : > { %2116 = vmatprep.subr.mxu0 %v2540_v0  ;;  %s2548_s9 = smov 116   ;;  %s2549_s12 = smov 84   ;;  %vm1426_vm8 = vcmask 195744   ;;  %vm1599_vm9 = vcmask 228544   ;;  %vm1772_vm10 = vcmask 261344  }
  0x5d   : > { %2117 = vmatpush3.msra.mxu0 %v310_v2  ;;  %s2550_s8 = smov 72   ;;  %s2551_s14 = smov 68  }
  0x5e   : > { %2118 = vmatprep.subr.mxu0 %v2540_v0  ;;  %s2552_s26 = smov 80   ;;  %s2553_s1 = smov 112  }
  0x5f   : > { %2119 = vmatpush3.msra.mxu0 %v309_v3  ;;  %s2554_s27 = smov 76   ;;  %s2555_s29 = smov 108  }
  0x60   : > { %2120 = vmatprep.subr.mxu0 %v2540_v0  ;;  %p3005_p0 = scmp.ne.s32.totalorder %s2999_s30, 0 }
  0x61   : > { %2121 = vmatpush3.msra.mxu0 %v308_v4 }
  0x62   : > { %2123 = vmatmul.mubr.msk.f32.vlgmr.msra.gmra.mxu0 %vm319_vm1, %v307_v5  ;;  %2145 = vmatprep.subr.mxu0 %v2540_v0 }
  0x63   : > { %2147 = vmatprep.mubr.msk.f32.mxu0 %vm2541_vm0, %v2540_v0 }
 0x122   : > { %v389_v7 = vpop.f32.mrf.mxu0 }
 0x123   : > { %v2758_v8 = vadd.f32 %v2029_v6, %v389_v7 }
 0x124   : > { %v2124_v9 = vpop.f32.mrf.mxu0 }
 0x125   : > { %486 = vrot.lane.b32.xlu1 %v2758_v8, %s2542_s13  ;;  %395 = vrot.lane.b32.xlu0 %v2758_v8, %s2543_s15  ;;  %v393_v10 = vmul.f32 0.5, %v2758_v8  ;;  %s2556_s13 = smov 104   ;;  %s2557_s15 = smov 100  }
 0x129   : > { %565 = vrot.lane.b32.xlu1 %v2758_v8, %s2544_s16  ;;  %s2028_s16 = sshll.u32 %s2728_s18, 6 }
 0x12d   : > { %563 = vrot.lane.b32.xlu1 %v393_v10, %s2545_s17  ;;  %s2804_s17 = scalar_lea.vmem [#allocation10], %s2028_s16  ;;  %s2570_s16 = smov 24  }
 0x131   : > { %738 = vrot.lane.b32.xlu1 %v2758_v8, %s2546_s10  ;;  %s2558_s10 = smov 60  }
 0x135   : > { %736 = vrot.lane.b32.xlu1 %v393_v10, %s2547_s11  ;;  %s2559_s11 = smov 52  }
 0x139   : > { %909 = vrot.lane.b32.xlu1 %v393_v10, %s2548_s9  ;;  %s2560_s9 = smov 48  }
 0x197   : > { %v487_v11 = vpop.permute.xlu1 %486  ;;  %v396_v12 = vpop.permute.xlu0 %395 }
 0x198   : > { %2126 = vmatpush3.xpose.msk.msra.mxu1 %vm397_vm2, %v396_v12 }
 0x199   : > { %2130 = vmatprep.subr.mxu1 %v2540_v0 }
 0x19b   : > { %v2767_v13 = vpop.permute.xlu1 %565  ;;  %2128 = vmatmul.mubr.msk.f32.vlgmr.msra.gmra.mxu1 %vm397_vm2, %v393_v10 }
 0x19c   : > { %2131 = vmatpush3.msra.mxu1 %v487_v11  ;;  %2132 = vmatprep.mubr.msk.f32.mxu1 %vm2541_vm0, %v2540_v0 }
 0x19d   : > { %2135 = vmatprep.subr.mxu1 %v2540_v0 }
 0x19f   : > { %v2773_v14 = vpop.permute.xlu1 %563 }
 0x1a3   : > { %v739_v15 = vpop.permute.xlu1 %738 }
 0x1a4   : > { %2146 = vmatpush3.xpose.msk.msra.mxu0 %vm397_vm2, %v739_v15 }
 0x1a5   : > { %2155 = vmatprep.subr.mxu0 %v2540_v0 }
 0x1a7   : > { %v737_v16 = vpop.permute.xlu1 %736 }
 0x1a8   : > { %2148 = vmatmul.mubr.msk.f32.vlgmr.msra.gmra.mxu0 %vm397_vm2, %v737_v16 }
 0x1a9   : > { %2157 = vmatprep.mubr.msk.f32.mxu0 %vm2541_vm0, %v2540_v0 }
 0x1ab   : > { %v910_v26 = vpop.permute.xlu1 %909 }
 0x25b   : > { %v469_v17 = vpop.f32.mrf.mxu1 }
 0x25c   : > { %v474_v18 = vsel %vm473_vm3, %v469_v17, -inf }
 0x25d   : > { %475 = vmax.xlane.f32.xlu0 %v474_v18  ;;  %v2129_v19 = vpop.f32.mrf.mxu1 }
 0x268   : > { %v2781_v20 = vpop.f32.mrf.mxu0 }
 0x269   : > { %v814_v29 = vsel %vm473_vm3, %v2781_v20, -inf }
 0x26a   : > { %v2149_v21 = vpop.f32.mrf.mxu0 }
 0x273   : > { %911 = vrot.lane.b32.xlu0 %v2758_v8, %s2549_s12  ;;  %s2561_s12 = smov 56  }
 0x277   : > { %1430 = vrot.lane.b32.xlu0 %v2758_v8, %s2550_s8  ;;  %s2562_s8 = smov 40  }
 0x27b   : > { %1603 = vrot.lane.b32.xlu0 %v2758_v8, %s2551_s14  ;;  %s2563_s14 = smov 44  }
 0x2e6   : > { %v476_v22 = vpop.xlane.xlu0 %475 }
 0x2e7   : > { %v477_v23 = vsub.f32 %v469_v17, %v476_v22 }
 0x2e9   : > { %v478_v24 = vmul.f32 1.442695, %v477_v23 }
 0x2ea   : > { %v912_v25 = vpop.permute.xlu0 %911 }
 0x2eb   : > { %2323 = vpow2.f32 %v478_v24  ;;  %2156 = vmatpush3.xpose.msk.msra.mxu0 %vm397_vm2, %v912_v25 }
 0x2ec   : > { %2165 = vmatprep.subr.mxu0 %v2540_v0 }
 0x2ee   : > { %2158 = vmatmul.mubr.msk.f32.vlgmr.msra.gmra.mxu0 %vm397_vm2, %v910_v26  ;;  %v1431_v35 = vpop.permute.xlu0 %1430 }
 0x2ef   : > { %2167 = vmatprep.mubr.msk.f32.mxu0 %vm2541_vm0, %v2540_v0 }
 0x2f2   : > { %v1604_v39 = vpop.permute.xlu0 %1603 }
 0x2f8   : > { %v2324_v27 = vpop.eup %2323 }
 0x2f9   : > { %v480_v28 = vsel %vm473_vm3, %v2324_v27, 0.0 }
 0x2fa   : > { %481 = vadd.xlane.f32.xlu1 %v480_v28 }
 0x30b   : > { %1084 = vrot.lane.b32.xlu1 %v2758_v8, %s2552_s26  ;;  %s2564_s26 = smov 36  }
 0x30f   : > { %1082 = vrot.lane.b32.xlu1 %v393_v10, %s2553_s1  ;;  %s2565_s1 = smov 4  }
 0x313   : > { %1257 = vrot.lane.b32.xlu1 %v2758_v8, %s2554_s27  ;;  %s2566_s27 = smov 8  }
 0x317   : > { %1255 = vrot.lane.b32.xlu1 %v393_v10, %s2555_s29  ;;  %s2567_s29 = smov 12  }
 0x31b   : > { %1428 = vrot.lane.b32.xlu1 %v393_v10, %s2556_s13  ;;  %s2568_s13 = smov 16  }
 0x31f   : > { %1601 = vrot.lane.b32.xlu1 %v393_v10, %s2557_s15  ;;  %s2569_s15 = smov 20  }
 0x343   : > { %815 = vmax.xlane.f32.xlu1 %v814_v29 }
 0x383   : > { %v482_v30 = vpop.xlane.xlu1 %481 }
 0x384   : > { %2325 = vrcp.f32 %v482_v30 }
 0x387   : > { %v1085_v31 = vpop.permute.xlu1 %1084 }
 0x388   : > { %2166 = vmatpush3.xpose.msk.msra.mxu0 %vm397_vm2, %v1085_v31 }
 0x389   : > { %2175 = vmatprep.subr.mxu0 %v2540_v0 }
 0x38b   : > { %v1083_v32 = vpop.permute.xlu1 %1082 }
 0x38c   : > { %2168 = vmatmul.mubr.msk.f32.vlgmr.msra.gmra.mxu0 %vm397_vm2, %v1083_v32 }
 0x38d   : > { %2177 = vmatprep.mubr.msk.f32.mxu0 %vm2541_vm0, %v2540_v0 }
 0x38f   : > { %v1258_v33 = vpop.permute.xlu1 %1257 }
 0x390   : > { %2176 = vmatpush3.xpose.msk.msra.mxu0 %vm397_vm2, %v1258_v33 }
 0x391   : > { %v2326_v34 = vpop.eup %2325  ;;  %2185 = vmatprep.subr.mxu0 %v2540_v0 }
 0x392   : > { %v484_v36 = vmul.f32 %v2326_v34, %v2324_v27 }
 0x393   : > { %v1256_v37 = vpop.permute.xlu1 %1255 }
 0x394   : > { %485 = vst.msk [vmem:[%s2804_s17] sm:$0xff] %vm473_vm3, %v484_v36  ;;  %2133 = vmatmul.mubr.msk.f32.vlgmr.msra.gmra.mxu1 %vm473_vm3, %v484_v36  ;;  %2178 = vmatmul.mubr.msk.f32.vlgmr.msra.gmra.mxu0 %vm397_vm2, %v1256_v37 }
 0x395   : > { %2136 = vmatpush3.xpose.msk.msra.mxu1 %vm397_vm2, %v2767_v13  ;;  %2186 = vmatpush3.xpose.msk.msra.mxu0 %vm397_vm2, %v1431_v35 }
 0x396   : > { %2137 = vmatprep.mubr.msk.f32.mxu1 %vm2541_vm0, %v2540_v0  ;;  %2187 = vmatprep.mubr.msk.f32.mxu0 %vm2541_vm0, %v2540_v0 }
 0x397   : > { %v1429_v38 = vpop.permute.xlu1 %1428  ;;  %2195 = vmatprep.subr.mxu0 %v2540_v0  ;;  %2140 = vmatprep.subr.mxu1 %v2540_v0 }
 0x398   : > { %2138 = vmatmul.mubr.msk.f32.vlgmr.msra.gmra.mxu1 %vm397_vm2, %v2773_v14  ;;  %2188 = vmatmul.mubr.msk.f32.vlgmr.msra.gmra.mxu0 %vm397_vm2, %v1429_v38 }
 0x399   : > { %2196 = vmatpush3.xpose.msk.msra.mxu0 %vm397_vm2, %v1604_v39  ;;  %2197 = vmatprep.mubr.msk.f32.mxu0 %vm2541_vm0, %v2540_v0 }
 0x39a   : > { %2142 = vmatprep.mubr.msk.f32.mxu1 %vm2541_vm0, %v2540_v0  ;;  %2205 = vmatprep.subr.mxu0 %v2540_v0 }
 0x39b   : > { %v1602_v40 = vpop.permute.xlu1 %1601 }
 0x39c   : > { %2198 = vmatmul.mubr.msk.f32.vlgmr.msra.gmra.mxu0 %vm397_vm2, %v1602_v40 }
 0x39d   : > { %2213 = vmatprep.mubr.msk.f32.mxu0 %vm2541_vm0, %v2540_v0 }
 0x3ae   : > { %v983_v41 = vpop.f32.mrf.mxu0 }
 0x3af   : > { %v987_v59 = vsel %vm473_vm3, %v983_v41, -inf }
 0x3b0   : > { %v2159_v42 = vpop.f32.mrf.mxu0 }
 0x3cc   : > { %v816_v43 = vpop.xlane.xlu1 %815 }
 0x3cd   : > { %v817_v44 = vsub.f32 %v2781_v20, %v816_v43 }
 0x3cf   : > { %v818_v46 = vmul.f32 1.442695, %v817_v44 }
 0x3d1   : > { %2327 = vpow2.f32 %v818_v46 }
 0x3de   : > { %v2328_v61 = vpop.eup %2327 }
 0x3df   : > { %v820_v1 = vsel %vm473_vm3, %v2328_v61, 0.0 }
 0x44c   : > { %v1156_v45 = vpop.f32.mrf.mxu0 }
 0x44d   : > { %v1160_v63 = vsel %vm473_vm3, %v1156_v45, -inf }
 0x44e   : > { %v2169_v47 = vpop.f32.mrf.mxu0 }
 0x454   : > { %v558_v48 = vpop.f32.mrf.mxu1  ;;  %v1329_v49 = vpop.f32.mrf.mxu0 }
 0x455   : > { %562 = vst.msk [vmem:[#allocation2] sm:$0xff] %vm397_vm2, %v558_v48  ;;  %v1333_v50 = vsel %vm473_vm3, %v1329_v49, -inf }
 0x456   : > { %v2134_v51 = vpop.f32.mrf.mxu1  ;;  %1334 = vmax.xlane.f32.xlu1 %v1333_v50  ;;  %v2179_v52 = vpop.f32.mrf.mxu0 }
 0x458   : > { %v637_v53 = vpop.f32.mrf.mxu1  ;;  %v1502_v54 = vpop.f32.mrf.mxu0 }
 0x459   : > { %v641_v55 = vsel %vm473_vm3, %v637_v53, -inf  ;;  %v1506_v2 = vsel %vm473_vm3, %v1502_v54, -inf }
 0x45a   : > { %642 = vmax.xlane.f32.xlu0 %v641_v55  ;;  %v2139_v56 = vpop.f32.mrf.mxu1  ;;  %v2189_v57 = vpop.f32.mrf.mxu0 }
 0x45c   : > { %v1675_v58 = vpop.f32.mrf.mxu0 }
 0x45d   : > { %v1679_v60 = vsel %vm473_vm3, %v1675_v58, -inf }
 0x45e   : > { %988 = vmax.xlane.f32.xlu0 %v987_v59  ;;  %1680 = vmax.xlane.f32.xlu1 %v1679_v60  ;;  %v2199_v62 = vpop.f32.mrf.mxu0 }
 0x462   : > { %1161 = vmax.xlane.f32.xlu0 %v1160_v63  ;;  %821 = vadd.xlane.f32.xlu1 %v820_v1 }
 0x466   : > { %1507 = vmax.xlane.f32.xlu0 %v1506_v2 }
 0x4df   : > { %v1335_v3 = vpop.xlane.xlu1 %1334 }
 0x4e0   : > { %v1336_v5 = vsub.f32 %v1329_v49, %v1335_v3 }
 0x4e2   : > { %v1337_v10 = vmul.f32 1.442695, %v1336_v5  ;;  %v1778_v5 = vld [vmem:[#allocation8 + $0x18] sm:$0xff] }
 0x4e3   : > { %v643_v4 = vpop.xlane.xlu0 %642  ;;  %2206 = vmatpush3.msra.mxu0 %v1778_v5 }
 0x4e4   : > { %v644_v16 = vsub.f32 %v637_v53, %v643_v4  ;;  %2207 = vmatprep.subr.mxu0 %v2540_v0 }
 0x4e6   : > { %v645_v21 = vmul.f32 1.442695, %v644_v16 }
 0x4e7   : > { %v989_v6 = vpop.xlane.xlu0 %988  ;;  %v1681_v7 = vpop.xlane.xlu1 %1680 }
 0x4e8   : > { %v990_v9 = vsub.f32 %v983_v41, %v989_v6  ;;  %v1682_v12 = vsub.f32 %v1675_v58, %v1681_v7  ;;  %v1777_v6 = vld [vmem:[#allocation8 + $0x10] sm:$0xff] }
 0x4e9   : > { %2208 = vmatpush3.msra.mxu0 %v1777_v6 }
 0x4ea   : > { %v991_v11 = vmul.f32 1.442695, %v990_v9  ;;  %v1683_v17 = vmul.f32 1.442695, %v1682_v12  ;;  %v1776_v9 = vld [vmem:[#allocation8 + $0x8] sm:$0xff]  ;;  %2209 = vmatprep.subr.mxu0 %v2540_v0 }
 0x4eb   : > { %v1162_v13 = vpop.xlane.xlu0 %1161  ;;  %v822_v14 = vpop.xlane.xlu1 %821  ;;  %2210 = vmatpush3.msra.mxu0 %v1776_v9 }
 0x4ec   : > { %2329 = vpow2.f32 %v991_v11  ;;  %v1163_v15 = vsub.f32 %v1156_v45, %v1162_v13  ;;  %v1775_v11 = vld [vmem:[#allocation8] sm:$0xff]  ;;  %2211 = vmatprep.subr.mxu0 %v2540_v0 }
 0x4ed   : > { %2331 = vpow2.f32 %v1337_v10  ;;  %2212 = vmatpush3.msra.mxu0 %v1775_v11 }
 0x4ee   : > { %v1164_v18 = vmul.f32 1.442695, %v1163_v15  ;;  %2333 = vrcp.f32 %v822_v14 }
 0x4ef   : > { %v1508_v19 = vpop.xlane.xlu0 %1507 }
 0x4f0   : > { %2335 = vpow2.f32 %v1164_v18  ;;  %v1509_v20 = vsub.f32 %v1502_v54, %v1508_v19 }
 0x4f1   : > { %2337 = vpow2.f32 %v1683_v17 }
 0x4f2   : > { %v1510_v22 = vmul.f32 1.442695, %v1509_v20 }
 0x4f4   : > { %2339 = vpow2.f32 %v1510_v22 }
 0x4f5   : > { %2341 = vpow2.f32 %v645_v21 }
 0x4f9   : > { %v2330_v23 = vpop.eup %2329 }
 0x4fa   : > { %v2332_v24 = vpop.eup %2331  ;;  %v993_v25 = vsel %vm473_vm3, %v2330_v23, 0.0 }
 0x4fb   : > { %v2334_v26 = vpop.eup %2333  ;;  %994 = vadd.xlane.f32.xlu0 %v993_v25  ;;  %v1339_v29 = vsel %vm473_vm3, %v2332_v24, 0.0 }
 0x4fc   : > { %v2841_v27 = vmul.f32 %v2334_v26, %v2328_v61 }
 0x4fd   : > { %v2336_v28 = vpop.eup %2335 }
 0x4fe   : > { %v1166_v30 = vsel %vm473_vm3, %v2336_v28, 0.0  ;;  %2040 = vst.msk [vmem:[%s2804_s17 + $0x10] sm:$0xff] %vm473_vm3, %v2841_v27  ;;  %v2338_v31 = vpop.eup %2337 }
 0x4ff   : > { %1340 = vadd.xlane.f32.xlu0 %v1339_v29  ;;  %1167 = vadd.xlane.f32.xlu1 %v1166_v30  ;;  %v1685_v34 = vsel %vm473_vm3, %v2338_v31, 0.0 }
 0x501   : > { %v2340_v32 = vpop.eup %2339 }
 0x502   : > { %v1512_v33 = vsel %vm473_vm3, %v2340_v32, 0.0  ;;  %v2342_v35 = vpop.eup %2341 }
 0x503   : > { %1513 = vadd.xlane.f32.xlu1 %v1512_v33  ;;  %1686 = vadd.xlane.f32.xlu0 %v1685_v34  ;;  %v647_v36 = vsel %vm473_vm3, %v2342_v35, 0.0 }
 0x507   : > { %648 = vadd.xlane.f32.xlu0 %v647_v36 }
 0x514   : > { %654 = vrot.lane.b32.xlu1 %v2758_v8, %s2558_s10  ;;  %s2571_s10 = smov 28  }
 0x518   : > { %1000 = vrot.lane.b32.xlu1 %v2758_v8, %s2559_s11  ;;  %s2071_s11 = sshll.u32 %s2631_s25, 10 }
 0x51c   : > { %1173 = vrot.lane.b32.xlu1 %v2758_v8, %s2560_s9  ;;  %s1892_s9 = sshll.u32 %s2804_s17, 4  ;;  %s2908_s9 = int_to_ptr.vmem [resolvable:$true] %s1892_s9 }
 0x51d   : > { %827 = vrot.lane.b32.xlu0 %v2758_v8, %s2561_s12 }
 0x520   : > { %1519 = vrot.lane.b32.xlu1 %v2758_v8, %s2562_s8 }
 0x521   : > { %1346 = vrot.lane.b32.xlu0 %v2758_v8, %s2563_s14  ;;  %s2906_s14 = scalar_lea.hbm %s2987_s6, %s2071_s11 }
 0x525   : > { %1692 = vrot.lane.b32.xlu0 %v2758_v8, %s2564_s26  ;;  %s1866_s26 = scalar_lea.sflag [#allocation11], %s2728_s18 }
 0x584   : > { %v995_v37 = vpop.xlane.xlu0 %994 }
 0x585   : > { %2343 = vrcp.f32 %v995_v37 }
 0x588   : > { %v1341_v38 = vpop.xlane.xlu0 %1340  ;;  %v1168_v39 = vpop.xlane.xlu1 %1167 }
 0x589   : > { %2345 = vrcp.f32 %v1341_v38 }
 0x58a   : > { %2347 = vrcp.f32 %v1168_v39 }
 0x58c   : > { %v1687_v40 = vpop.xlane.xlu0 %1686  ;;  %v1514_v41 = vpop.xlane.xlu1 %1513 }
 0x58d   : > { %2349 = vrcp.f32 %v1687_v40 }
 0x58e   : > { %2351 = vrcp.f32 %v1514_v41 }
 0x590   : > { %v649_v42 = vpop.xlane.xlu0 %648  ;;  %v655_v43 = vpop.permute.xlu1 %654 }
 0x591   : > { %2353 = vrcp.f32 %v649_v42  ;;  %2141 = vmatpush3.msra.mxu1 %v655_v43 }
 0x592   : > { %v2344_v44 = vpop.eup %2343  ;;  %2150 = vmatprep.subr.mxu1 %v2540_v0 }
 0x593   : > { %v997_v8 = vmul.f32 %v2344_v44, %v2330_v23 }
 0x594   : > { %v828_v55 = vpop.permute.xlu0 %827  ;;  %v1001_v56 = vpop.permute.xlu1 %1000 }
 0x595   : > { %2044 = vst.msk [vmem:[%s2804_s17 + $0x18] sm:$0xff] %vm473_vm3, %v997_v8 }
 0x596   : > { %v2346_v45 = vpop.eup %2345 }
 0x597   : > { %v2348_v46 = vpop.eup %2347  ;;  %v1343_v47 = vmul.f32 %v2346_v45, %v2332_v24 }
 0x598   : > { %v1170_v48 = vmul.f32 %v2348_v46, %v2336_v28  ;;  %v1174_v57 = vpop.permute.xlu1 %1173  ;;  %v1347_v58 = vpop.permute.xlu0 %1346 }
 0x599   : > { %2052 = vst.msk [vmem:[%s2804_s17 + $0x28] sm:$0xff] %vm473_vm3, %v1343_v47 }
 0x59a   : > { %v2350_v49 = vpop.eup %2349  ;;  %2048 = vst.msk [vmem:[%s2804_s17 + $0x20] sm:$0xff] %vm473_vm3, %v1170_v48 }
 0x59b   : > { %v2352_v50 = vpop.eup %2351  ;;  %v1689_v51 = vmul.f32 %v2350_v49, %v2338_v31 }
 0x59c   : > { %v1516_v52 = vmul.f32 %v2352_v50, %v2340_v32  ;;  %v1520_v59 = vpop.permute.xlu1 %1519  ;;  %v1693_v60 = vpop.permute.xlu0 %1692 }
 0x59d   : > { %2060 = vst.msk [vmem:[%s2804_s17 + $0x38] sm:$0xff] %vm473_vm3, %v1689_v51 }
 0x59e   : > { %v2354_v53 = vpop.eup %2353  ;;  %2056 = vst.msk [vmem:[%s2804_s17 + $0x30] sm:$0xff] %vm473_vm3, %v1516_v52 }
 0x59f   : > { %v651_v54 = vmul.f32 %v2354_v53, %v2342_v35 }
 0x5a1   : > { %2036 = vst.msk [vmem:[%s2804_s17 + $0x8] sm:$0xff] %vm473_vm3, %v651_v54  ;;  %2143 = vmatmul.mubr.msk.f32.vlgmr.msra.gmra.mxu1 %vm473_vm3, %v651_v54 }
 0x5a2   : > { %2151 = vmatpush3.msra.mxu1 %v828_v55  ;;  %2152 = vmatprep.mubr.msk.f32.mxu1 %vm2541_vm0, %v2540_v0 }
 0x5a3   : > { %2160 = vmatprep.subr.mxu1 %v2540_v0 }
 0x5a5   : > { %2153 = vmatmul.mubr.msk.f32.vlgmr.msra.gmra.mxu1 %vm473_vm3, %v2841_v27 }
 0x5a6   : > { %2161 = vmatpush3.msra.mxu1 %v1001_v56  ;;  %2162 = vmatprep.mubr.msk.f32.mxu1 %vm2541_vm0, %v2540_v0 }
 0x5a7   : > { %2170 = vmatprep.subr.mxu1 %v2540_v0 }
 0x5a9   : > { %2163 = vmatmul.mubr.msk.f32.vlgmr.msra.gmra.mxu1 %vm473_vm3, %v997_v8 }
 0x5aa   : > { %2171 = vmatpush3.msra.mxu1 %v1174_v57  ;;  %2172 = vmatprep.mubr.msk.f32.mxu1 %vm2541_vm0, %v2540_v0 }
 0x5ab   : > { %2180 = vmatprep.subr.mxu1 %v2540_v0 }
 0x5ad   : > { %2173 = vmatmul.mubr.msk.f32.vlgmr.msra.gmra.mxu1 %vm473_vm3, %v1170_v48 }
 0x5ae   : > { %2181 = vmatpush3.msra.mxu1 %v1347_v58  ;;  %2182 = vmatprep.mubr.msk.f32.mxu1 %vm2541_vm0, %v2540_v0 }
 0x5af   : > { %2190 = vmatprep.subr.mxu1 %v2540_v0 }
 0x5b1   : > { %2183 = vmatmul.mubr.msk.f32.vlgmr.msra.gmra.mxu1 %vm473_vm3, %v1343_v47 }
 0x5b2   : > { %2191 = vmatpush3.msra.mxu1 %v1520_v59  ;;  %2192 = vmatprep.mubr.msk.f32.mxu1 %vm2541_vm0, %v2540_v0 }
 0x5b3   : > { %2200 = vmatprep.subr.mxu1 %v2540_v0 }
 0x5b5   : > { %2193 = vmatmul.mubr.msk.f32.vlgmr.msra.gmra.mxu1 %vm473_vm3, %v1516_v52 }
 0x5b6   : > { %2201 = vmatpush3.msra.mxu1 %v1693_v60  ;;  %2202 = vmatprep.mubr.msk.f32.mxu1 %vm2541_vm0, %v2540_v0 }
 0x5b9   : > { %2203 = vmatmul.mubr.msk.f32.vlgmr.msra.gmra.mxu1 %vm473_vm3, %v1689_v51 }
 0x661   : > { %v726_v61 = vpop.f32.mrf.mxu1 }
 0x662   : > { %731 = vrot.lane.b32.xlu1 %v726_v61, %s2565_s1  ;;  %s2435_s1 = scalar_lea.vmem %s2908_s9, 1024 }
 0x663   : > { %v2144_v62 = vpop.f32.mrf.mxu1  ;;  %p2436_p11 = scmp.ne.s32.totalorder %s2908_s9, %s2435_s1 }
 0x665   : > { %v899_v63 = vpop.f32.mrf.mxu1  ;;  %p2437_p1 = pnand %p2436_p11, %p3005_p0 }
 0x666   : > { %904 = vrot.lane.b32.xlu0 %v899_v63, %s2566_s27 }
 0x667   : > { %v2154_v1 = vpop.f32.mrf.mxu1  ;;  %p2438_p2 = pneg %p2437_p1 }
 0x669   : > { %v1072_v2 = vpop.f32.mrf.mxu1 }
 0x66a   : > { %1077 = vrot.lane.b32.xlu1 %v1072_v2, %s2567_s29  ;;  %s2572_s29 = smov [#allocation10]  }
 0x66b   : > { %v2164_v3 = vpop.f32.mrf.mxu1 }
 0x66d   : > { %v1245_v4 = vpop.f32.mrf.mxu1 }
 0x66e   : > { %1250 = vrot.lane.b32.xlu0 %v1245_v4, %s2568_s13  ;;  %s2439_s13 = sshll.u32 %s2572_s29, 4  ;;  %s2440_s13 = int_to_ptr.vmem [resolvable:$false] %s2439_s13 }
 0x66f   : > { %v2174_v7 = vpop.f32.mrf.mxu1  ;;  %s2441_s17 = scalar_lea.vmem %s2440_s13, 2048  ;;  %p2442_p6 = scmp.lt.s32.totalorder %s2908_s9, %s2440_s13 }
 0x670   : > { %p2443_p12 = scmp.lt.s32.totalorder %s2441_s17, %s2435_s1 }
 0x671   : > { %v1418_v10 = vpop.f32.mrf.mxu1 }
 0x672   : > { %1423 = vrot.lane.b32.xlu1 %v1418_v10, %s2569_s15  ;;  %p2444_p7 = por %p2443_p12, %p2442_p6 }
 0x673   : > { %v2184_v12 = vpop.f32.mrf.mxu1 }
 0x674   : > { %p2445_p9 = pnand %p2444_p7, %p2438_p2 }
 0x675   : > { %v1591_v13 = vpop.f32.mrf.mxu1 }
 0x676   : > { %1596 = vrot.lane.b32.xlu0 %v1591_v13, %s2570_s16 }
 0x677   : > { %v2194_v14 = vpop.f32.mrf.mxu1 }
 0x679   : > { %v1764_v15 = vpop.f32.mrf.mxu1 }
 0x67a   : > { %1769 = vrot.lane.b32.xlu1 %v1764_v15, %s2571_s10 }
 0x67b   : > { %v2204_v16 = vpop.f32.mrf.mxu1 }
 0x6d4   : > { %v732_v17 = vpop.permute.xlu1 %731 }
 0x6d5   : > { %735 = vst.msk [vmem:[#allocation2] sm:$0xff] %vm734_vm4, %v732_v17 }
 0x6d8   : > { %v905_v18 = vpop.permute.xlu0 %904 }
 0x6d9   : > { %908 = vst.msk [vmem:[#allocation2] sm:$0xff] %vm907_vm5, %v905_v18 }
 0x6dc   : > { %v1078_v19 = vpop.permute.xlu1 %1077 }
 0x6dd   : > { %1081 = vst.msk [vmem:[#allocation2] sm:$0xff] %vm1080_vm6, %v1078_v19 }
 0x6e0   : > { %v1251_v0 = vpop.permute.xlu0 %1250 }
 0x6e1   : > { %1254 = vst.msk [vmem:[#allocation2] sm:$0xff] %vm1253_vm7, %v1251_v0 }
 0x6e4   : > { %v1424_v20 = vpop.permute.xlu1 %1423 }
 0x6e5   : > { %1427 = vst.msk [vmem:[#allocation2] sm:$0xff] %vm1426_vm8, %v1424_v20 }
 0x6e8   : > { %v1597_v21 = vpop.permute.xlu0 %1596 }
 0x6e9   : > { %1600 = vst.msk [vmem:[#allocation2] sm:$0xff] %vm1599_vm9, %v1597_v21 }
 0x6ec   : > { %v1770_v22 = vpop.permute.xlu1 %1769 }
 0x6ed   : > { %1773 = vst.msk [vmem:[#allocation2] sm:$0xff] %vm1772_vm10, %v1770_v22 }
 0x6f4   : > { %v1774_v23 = vld [vmem:[#allocation2] sm:$0xff] }
 0x6f5   : > { %2214 = vmatmul.mubr.msk.f32.vlgmr.msra.gmra.mxu0 %vm319_vm1, %v1774_v23 }
 0x6f6   : > { %2448 = shalt.err (!%p2445_p9)
}
 0x6f7   : > { %s2449_s15 = scalar_lea.hbm %s2906_s14, 1024  ;;  %s2453_s11 = scalar_lea.hbm %s2987_s6, 2048 }
 0x6f8   : > { %p2450_p13 = scmp.ne.s32.totalorder %s2906_s14, %s2449_s15  ;;  %p2454_p4 = scmp.lt.s32.totalorder %s2906_s14, %s2987_s6 }
 0x6f9   : > { %p2455_p8 = scmp.lt.s32.totalorder %s2453_s11, %s2449_s15 }
 0x6fa   : > { %p2451_p5 = pnand %p2450_p13, %p3005_p0 }
 0x6fb   : > { %p2456_p3 = por %p2455_p8, %p2454_p4 }
 0x6fc   : > { %p2452_p10 = pneg %p2451_p5 }
 0x6fe   : > { %p2457_p11 = pnand %p2456_p3, %p2452_p10 }
 0x700   : > { %2460 = shalt.err (!%p2457_p11)
}
 0x701   : > { %s2573_s1 = smov 128   ;;  %v2062_v24 = vld [vmem:[%s2985_s4] ss:$0 sm:$0xff]  ;;  %s2066_s17 = sshll.u32 %s2631_s25, 7 }
 0x702   : > { %2227 = dma.vmem_to_hbm [thread:$0]  (%p3005_p0), %s2908_s9, 1024, %s2906_s14, %s1866_s26, %s2573_s1, %s2573_s1, %s2566_s27  }
 0x703   : > { %s299_s15 = scalar_lea.vmem [#allocation9], %s2024_s20  ;;  %s2943_s12 = scalar_lea.hbm %s2986_s5, %s2066_s17 }
 0x704   : > { %s1879_s16 = sshll.u32 %s299_s15, 4  ;;  %s1861_s27 = scalar_lea.sflag [#allocation5], %s2728_s18  ;;  %s1880_s16 = int_to_ptr.vmem [resolvable:$true] %s1879_s16 }
 0x705   : > { %s2461_s9 = scalar_lea.vmem %s1880_s16, 128  ;;  %s2574_s25 = smov [#allocation9]  }
 0x706   : > { %p2462_p1 = scmp.ne.s32.totalorder %s1880_s16, %s2461_s9  ;;  %s2465_s20 = sshll.u32 %s2574_s25, 4  ;;  %s2466_s20 = int_to_ptr.vmem [resolvable:$false] %s2465_s20 }
 0x707   : > { %s2467_s14 = scalar_lea.vmem %s2466_s20, 256  ;;  %p2468_p12 = scmp.lt.s32.totalorder %s1880_s16, %s2466_s20 }
 0x708   : > { %p2463_p2 = pnand %p2462_p1, %p3005_p0  ;;  %p2469_p7 = scmp.lt.s32.totalorder %s2467_s14, %s2461_s9 }
 0x70a   : > { %p2464_p6 = pneg %p2463_p2  ;;  %p2470_p9 = por %p2469_p7, %p2468_p12 }
 0x70c   : > { %p2471_p13 = pnand %p2470_p9, %p2464_p6 }
 0x7b5   : > { %v1855_v25 = vpop.f32.mrf.mxu0 }
 0x7b6   : > { %v1856_v26 = vadd.f32 %v2062_v24, %v1855_v25 }
 0x7b7   : > { %v2215_v27 = vpop.f32.mrf.mxu0 }
 0x7b8   : > { %1859 = vst.msk [vmem:[%s299_s15] sm:$0xff] %vm319_vm1, %v1856_v26 }
 0x7b9   : > { %2474 = shalt.err (!%p2471_p13)
}
 0x7ba   : > { %s2475_s26 = scalar_lea.hbm %s2943_s12, 128  ;;  %s2479_s1 = scalar_lea.hbm %s2986_s5, 256 }
 0x7bb   : > { %p2476_p5 = scmp.ne.s32.totalorder %s2943_s12, %s2475_s26  ;;  %p2480_p8 = scmp.lt.s32.totalorder %s2943_s12, %s2986_s5 }
 0x7bc   : > { %p2481_p3 = scmp.lt.s32.totalorder %s2479_s1, %s2475_s26 }
 0x7bd   : > { %p2477_p10 = pnand %p2476_p5, %p3005_p0 }
 0x7be   : > { %p2482_p11 = por %p2481_p3, %p2480_p8 }
 0x7bf   : > { %p2478_p4 = pneg %p2477_p10 }
 0x7c1   : > { %p2483_p1 = pnand %p2482_p11, %p2478_p4 }
 0x7c3   : > { %2486 = shalt.err (!%p2483_p1)
}
 0x7c4   : > { %2226 = dma.vmem_to_hbm [thread:$0]  (%p3005_p0), %s1880_s16, 128, %s2943_s12, %s1861_s27  }
 0x7c5 PF: > { %s1907_s17 = sand.u32 1, %s2521_s21   ;;  %p3006_p2 = scmp.ne.s32.totalorder %s2994_s28, 0 }
 0x7c6   : > { %p3007_p6 = scmp.ge.s32.totalorder %s2533_s24, 2  ;;  %s1908_s15 = scalar_lea.sflag [#allocation5], %s1907_s17 }
 0x7c8   : > { %p2242_p12 = pnand %p3007_p6, %p3006_p2 }
 0x7ca   : > { %p2243_p7 = pneg %p2242_p12 }
 0x7cc   : > { %2512 = dma.done.wait (%p2243_p7), %s1908_s15, 128  }
 0x7cd   : > { %2514 = vsyncadd (%p2243_p7), %s1908_s15, 4294967168  ;;  %s1917_s10 = scalar_lea.sflag [#allocation11], %s1907_s17 }
 0x7ce   : > { %2516 = dma.done.wait (%p2243_p7), %s1917_s10, 1024  }
 0x7cf   : > { %2518 = vsyncadd (%p2243_p7), %s1917_s10, 4294966272  ;;  %p24_p0 = scmp.ge.s32.totalorder %s2682_s19, 4   ;;  %s3008_s21 = smov %s2525_s22 }
 0x7d0   : > { %s3009_s22 = smov %s2529_s23  ;;  %s3010_s23 = smov %s2698_s7 }
 0x7d1   : > { %s3011_s24 = smov %s2682_s19  ;;  %26 = sbr.rel (!%p24_p0) target bundleno = 10 (0xa), region = 117 }
 0x7d6   :  { %1922 = vsyncpa [#allocation4], 1 }
 0x7d7   :  { %1924 = vsyncpa [#allocation4 + $0x1], 1 }
 0x7d8   :  { %1925 = vsyncpa [#allocation7], 1 }
 0x7d9   :  { %1926 = vsyncpa [#allocation5], 1 }
 0x7da   :  { %1928 = vsyncpa [#allocation5 + $0x1], 1 }
 0x7db   :  { %1929 = vsyncpa [#allocation11], 1 }
 0x7dc   :  { %1931 = vsyncpa [#allocation11 + $0x1], 1 }

</bundles_post_ra>
